<compile_context>
chip_gen: v6e
topology: v6e:2x2x1
jax: 0.10.0
libtpu: 0.0.40
codegen_flags: <defaults>
</compile_context>

<pallas_src>
import numpy as np
import jax
import jax.numpy as jnp
from jax.experimental import pallas as pl
from jax.experimental.pallas import tpu as pltpu


def _round_up(x, m):
    return (x + m - 1) // m * m


# ---------------------------------------------------------------------------
# Fused kernel:  o = X @ W + b    (bf16 operands, f32 MXU accumulation)
# ---------------------------------------------------------------------------
def _projector_kernel(x_ref, w_ref, b_ref, o_ref):
    acc = jnp.dot(x_ref[...], w_ref[...], preferred_element_type=jnp.float32)
    o_ref[...] = (acc + b_ref[...]).astype(o_ref.dtype)


def _pick_tm(m_rows, k, n_out, vmem_budget_bytes):
    """Largest power-of-two M-tile whose double-buffered VMEM working set fits."""
    tm = 1024 if m_rows >= 4096 else 512
    fixed = 2 * k * n_out * 2 + 2 * 8 * n_out * 4            # weights + bias (2 bufs)
    per_row = 2 * (2 * k) + 2 * (4 * n_out)                  # bf16 X + f32 out (2 bufs)
    while tm > 8 and fixed + tm * per_row > vmem_budget_bytes:
        tm //= 2
    # v7x megacore: prefer >=2 grid tiles instead of one huge tile.
    if m_rows <= tm:
        tm = max(8, _round_up((m_rows + 1) // 2, 8))
    return tm


def _projector_matmul(x_flat, w_mat, b_row, *, tm):
    """x_flat: (Mg, K) bf16; w_mat: (K, Nout) bf16; b_row: (1, Nout) f32."""
    Mg, K = x_flat.shape
    _, Nout = w_mat.shape
    return pl.pallas_call(
        _projector_kernel,
        out_shape=jax.ShapeDtypeStruct((Mg, Nout), jnp.float32),
        grid=(pl.cdiv(Mg, tm),),                              # ragged last block OK
        in_specs=[
            pl.BlockSpec((tm, K), lambda i: (i, 0)),          # activations (no K pad)
            pl.BlockSpec((K, Nout), lambda i: (0, 0)),        # grid-invariant weights
            pl.BlockSpec((1, Nout), lambda i: (0, 0)),        # folded bias
        ],
        out_specs=pl.BlockSpec((tm, Nout), lambda i: (i, 0)),
        compiler_params=pltpu.CompilerParams(
            dimension_semantics=("parallel",),                # 2 TCs on v7x
            vmem_limit_bytes=32 * 1024 * 1024,
        ),
    )(x_flat, w_mat, b_row)


# ---------------------------------------------------------------------------
# Parameter init matching the PyTorch module:
#   conv weights ~ N(0, 0.01), biases default uniform(+-1/sqrt(fan_in)).
# Weights stored as (NB, Cin, num_classes) == torch OIHW (N, Cin, 1, 1) transposed.
# ---------------------------------------------------------------------------
def init_params(key, num_channels, num_classes, num_branches=4):
    kw, kb = jax.random.split(key)
    w = 0.01 * jax.random.normal(
        kw, (num_branches, num_channels, num_classes), jnp.float32)
    bound = 1.0 / np.sqrt(num_channels)
    b = jax.random.uniform(
        kb, (num_branches, num_classes), jnp.float32, minval=-bound, maxval=bound)
    return {"w": w, "b": b}


# ---------------------------------------------------------------------------
# Projector forward.  Input is NCHW; output NCHW (PyTorch convention) by default.
# ---------------------------------------------------------------------------
def projector_forward(x_nchw, params, *, stride=2, compute_dtype=jnp.bfloat16,
                      nchw_output=True):
    w = params["w"]                                # (NB, Cin, N) f32
    b = params["b"]                                # (NB, N)      f32
    _, Cin, N = w.shape

    # Fold the four branches in f32 (numerically safer than folding in bf16).
    w_sum = w.sum(axis=0)                          # (Cin, N) f32
    b_sum = b.sum(axis=0)                          # (N,)     f32

    # stride-2, padding-0, dilation-1, 1x1 conv == spatial subsample + matmul.
    # Cast to bf16 BEFORE the relayout to halve transpose traffic.
    xs = x_nchw[:, :, ::stride, ::stride].astype(compute_dtype)
    B, _, Ho, Wo = xs.shape
    M = B * Ho * Wo
    x_flat = jnp.transpose(xs, (0, 2, 3, 1)).reshape(M, Cin)   # (M, Cin) bf16

    # Small-N output packing: G = 128/N spatial rows per 128-lane output row via
    # a block-diagonal folded weight -> lane-dense stores with no write padding.
    if N < 128 and 128 % N == 0 and M % (128 // N) == 0:
        G = 128 // N
    else:
        G = 1

    if G > 1:
        K, Nout = G * Cin, G * N
        x_in = x_flat.reshape(M // G, K)                         # free row-major regroup
        w_in = jnp.kron(jnp.eye(G, dtype=jnp.float32), w_sum)    # (G*Cin, 128) block-diag
        b_in = jnp.tile(b_sum, G)[None, :]                       # (1, 128)
    else:
        K, Nout = Cin, _round_up(N, 128)                         # lane-dense stores
        x_in = x_flat                                            # no K/M zero-pad copy
        w_in = jnp.zeros((Cin, Nout), jnp.float32).at[:, :N].set(w_sum)
        b_in = jnp.zeros((1, Nout), jnp.float32).at[0, :N].set(b_sum)

    w_in = w_in.astype(compute_dtype)
    Mg = x_in.shape[0]
    tm = _pick_tm(Mg, K, Nout, vmem_budget_bytes=24 * 1024 * 1024)

    out = _projector_matmul(x_in, w_in, b_in, tm=tm)             # (Mg, Nout) f32

    out = out.reshape(M, N) if G > 1 else out[:, :N]
    out = out.reshape(B, Ho, Wo, N)
    if nchw_output:
        out = jnp.transpose(out, (0, 3, 1, 2))
    return out


if __name__ == "__main__":
    B, Cin, H, W = 2, 4, 16, 16
    num_classes = 8

    key = jax.random.PRNGKey(0)
    k_inp, k_par = jax.random.split(key)
    x = jax.random.normal(k_inp, (B, Cin, H, W), jnp.float32)
    params = init_params(k_par, Cin, num_classes)

    fwd = jax.jit(projector_forward)
    out = fwd(x, params)
    jax.block_until_ready(out)

    Ho, Wo = (H + 1) // 2, (W + 1) // 2
    assert out.shape == (B, num_classes, Ho, Wo), out.shape
    assert out.dtype == jnp.float32

    # Plain-JAX f32 reference; bf16 kernel operands -> loose tolerance.
    xs = x[:, :, ::2, ::2]
    ref = (jnp.einsum("bchw,cn->bnhw", xs, params["w"].sum(0))
           + params["b"].sum(0)[None, :, None, None])
    np.testing.assert_allclose(np.asarray(out), np.asarray(ref),
                               atol=2e-2, rtol=2e-2)
    print("KERNEL_OK")
</pallas_src>

<mosaic_0001>
module attributes {stable_mosaic.version = 11 : i64} {
  func.func @_projector_kernel(%arg0: i32, %arg1: memref<8x64xbf16, #tpu.memory_space<vmem>>, %arg2: memref<64x128xbf16, #tpu.memory_space<vmem>>, %arg3: memref<1x128xf32, #tpu.memory_space<vmem>>, %arg4: memref<8x128xf32, #tpu.memory_space<vmem>>) attributes {dimension_semantics = [#tpu.dimension_semantics<parallel>], iteration_bounds = array<i64: 1>, scalar_prefetch = 0 : i64, scratch_operands = 0 : i64, tpu.core_type = #tpu.core_type<tc>, window_params = [{transform_indices = @transform_0, window_bounds = array<i64: 8, 64>}, {pipeline_mode = #tpu.pipeline_mode<synchronous>, transform_indices = @transform_1, window_bounds = array<i64: 64, 128>}, {pipeline_mode = #tpu.pipeline_mode<synchronous>, transform_indices = @transform_2, window_bounds = array<i64: 1, 128>}, {transform_indices = @transform_3, window_bounds = array<i64: 8, 128>}]} {
    %c0 = arith.constant 0 : index
    %c0_0 = arith.constant 0 : index
    %0 = vector.load %arg1[%c0, %c0_0] : memref<8x64xbf16, #tpu.memory_space<vmem>>, vector<8x64xbf16>
    %c0_1 = arith.constant 0 : index
    %c0_2 = arith.constant 0 : index
    %1 = vector.load %arg2[%c0_1, %c0_2] : memref<64x128xbf16, #tpu.memory_space<vmem>>, vector<64x128xbf16>
    %cst = arith.constant dense<0.000000e+00> : vector<8x128xf32>
    %2 = tpu.matmul %0, %1, %cst {dimension_numbers = #tpu.dot_dimension_numbers<[1], [0], [0], [1], [0, 0, 1, 1], [], []>} : vector<8x64xbf16>, vector<64x128xbf16>, vector<8x128xf32> -> vector<8x128xf32>
    %c0_3 = arith.constant 0 : index
    %c0_4 = arith.constant 0 : index
    %3 = vector.load %arg3[%c0_3, %c0_4] : memref<1x128xf32, #tpu.memory_space<vmem>>, vector<1x128xf32>
    %4 = vector.broadcast %3 : vector<1x128xf32> to vector<8x128xf32>
    %5 = arith.addf %2, %4 : vector<8x128xf32>
    %c0_5 = arith.constant 0 : index
    %c0_6 = arith.constant 0 : index
    %6 = vector.load %arg4[%c0_5, %c0_6] : memref<8x128xf32, #tpu.memory_space<vmem>>, vector<8x128xf32>
    tpu.vector_store %arg4[%c0_5, %c0_6], %5 {strides = array<i32>} : memref<8x128xf32, #tpu.memory_space<vmem>>, vector<8x128xf32>,
    return
  }
  func.func @transform_0(%arg0: i32) -> (i32, i32) {
    %c0_i32 = arith.constant 0 : i32
    %c0_i32_0 = arith.constant 0 : i32
    return %arg0, %c0_i32 : i32, i32
  }
  func.func @transform_1(%arg0: i32) -> (i32, i32) {
    %c0_i32 = arith.constant 0 : i32
    %c0_i32_0 = arith.constant 0 : i32
    %c0_i32_1 = arith.constant 0 : i32
    return %c0_i32, %c0_i32_0 : i32, i32
  }
  func.func @transform_2(%arg0: i32) -> (i32, i32) {
    %c0_i32 = arith.constant 0 : i32
    %c0_i32_0 = arith.constant 0 : i32
    %c0_i32_1 = arith.constant 0 : i32
    return %c0_i32, %c0_i32_0 : i32, i32
  }
  func.func @transform_3(%arg0: i32) -> (i32, i32) {
    %c0_i32 = arith.constant 0 : i32
    %c0_i32_0 = arith.constant 0 : i32
    return %arg0, %c0_i32 : i32, i32
  }
}

</mosaic_0001>

<bundles_post_ra>
// kernel: tile.8
= control target key start
LH: loop header
LB: loop body
LE: loop exit
PB: predicated region body
PF: predicated region fallthrough
CT: control target
= control target key end

     0   :  { %s28_s0 = inlined_call_operand.vmem [shape: f32[8], index: 0, kind: input, shape index: {}]   ;;  %s29_s1 = inlined_call_operand.vmem [shape: f32[16,8], index: 1, kind: output, shape index: {}]  }
   0x1   :  { %v4_v0 = vld [vmem:[%s28_s0] ss:$0 sm:$0xff] }
   0x2   :  { %5 = vst [vmem:[%s29_s1] sm:$0xff] %v4_v0  ;;  %8 = vst [vmem:[%s29_s1 + $0x8] sm:$0xff] %v4_v0 }

// kernel: tile.9
= control target key start
LH: loop header
LB: loop body
LE: loop exit
PB: predicated region body
PF: predicated region fallthrough
CT: control target
= control target key end

     0   :  { %s133_s10 = smov 120   ;;  %s134_s11 = smov 104   ;;  %vm3_vm0 = vcmask 64512   ;;  %vm9_vm1 = vcmask 1048512   ;;  %vm15_vm2 = vcmask 982912   ;;  %vm21_vm3 = vcmask 917312   ;;  %s209_s0 = inlined_call_operand.vmem [shape: f32[16,8], index: 0, kind: input, shape index: {}]   ;;  %s210_s1 = inlined_call_operand.vmem [shape: f32[1,128], index: 1, kind: output, shape index: {}]  }
   0x1   :  { %v103_v0 = vld [vmem:[%s209_s0 + $0xf] sm:$0x1]   ;;  %v105_v1 = vld [vmem:[%s209_s0 + $0xd] sm:$0x1]   ;;  %v104_v2 = vld [vmem:[%s209_s0 + $0xe] sm:$0x1]  }
   0x2   :  { %7 = vrot.lane.b32.xlu0 %v103_v0, %s133_s10  ;;  %19 = vrot.lane.b32.xlu1 %v105_v1, %s134_s11  ;;  %v106_v3 = vld [vmem:[%s209_s0 + $0xc] sm:$0x1]   ;;  %s135_s16 = smov 112   ;;  %s136_s17 = smov 96   ;;  %v107_v4 = vld [vmem:[%s209_s0 + $0xb] sm:$0x1]  }
   0x3   :  { %v108_v5 = vld [vmem:[%s209_s0 + $0xa] sm:$0x1]   ;;  %v2_v6 = vld [vmem:[%s209_s0] sm:$0x1]   ;;  %s137_s24 = smov 88   ;;  %s138_s25 = smov 80  }
   0x4   :  { %4 = vst.msk [vmem:[#allocation0] sm:$0x1] %vm3_vm0, %v2_v6   ;;  %v109_v7 = vld [vmem:[%s209_s0 + $0x9] sm:$0x1]   ;;  %v110_v8 = vld [vmem:[%s209_s0 + $0x8] sm:$0x1]  }
   0x5   :  { %s139_s30 = smov 72   ;;  %s140_s2 = smov 64   ;;  %v111_v9 = vld [vmem:[%s209_s0 + $0x7] sm:$0x1]   ;;  %v112_v10 = vld [vmem:[%s209_s0 + $0x6] sm:$0x1]  }
   0x6   :  { %13 = vrot.lane.b32.xlu0 %v104_v2, %s135_s16  ;;  %25 = vrot.lane.b32.xlu1 %v106_v3, %s136_s17  ;;  %s141_s7 = smov 56   ;;  %s142_s8 = smov 48   ;;  %v113_v11 = vld [vmem:[%s209_s0 + $0x5] sm:$0x1]   ;;  %v114_v12 = vld [vmem:[%s209_s0 + $0x4] sm:$0x1]  }
   0x7   :  { %s143_s13 = smov 40   ;;  %s144_s14 = smov 32   ;;  %v115_v13 = vld [vmem:[%s209_s0 + $0x3] sm:$0x1]   ;;  %v116_v14 = vld [vmem:[%s209_s0 + $0x2] sm:$0x1]  }
   0x8   :  { %s145_s19 = smov 24   ;;  %s146_s20 = smov 16   ;;  %v117_v15 = vld [vmem:[%s209_s0 + $0x1] sm:$0x1]   ;;  %vm27_vm4 = vcmask 851712   ;;  %vm33_vm5 = vcmask 786112  }
   0x9   :  { %s147_s0 = smov 8   ;;  %vm39_vm6 = vcmask 720512   ;;  %vm45_vm7 = vcmask 654912   ;;  %vm51_vm8 = vcmask 589312   ;;  %vm57_vm9 = vcmask 523712  }
   0xa   :  { %31 = vrot.lane.b32.xlu0 %v107_v4, %s137_s24  ;;  %37 = vrot.lane.b32.xlu1 %v108_v5, %s138_s25  ;;  %vm63_vm10 = vcmask 458112   ;;  %vm69_vm11 = vcmask 392512   ;;  %vm75_vm12 = vcmask 326912   ;;  %vm81_vm13 = vcmask 261312  }
   0xb   :  { %vm87_vm14 = vcmask 195712   ;;  %vm93_vm15 = vcmask 130112  }
   0xe   :  { %43 = vrot.lane.b32.xlu0 %v109_v7, %s139_s30  ;;  %49 = vrot.lane.b32.xlu1 %v110_v8, %s140_s2 }
  0x12   :  { %55 = vrot.lane.b32.xlu0 %v111_v9, %s141_s7  ;;  %61 = vrot.lane.b32.xlu1 %v112_v10, %s142_s8 }
  0x16   :  { %67 = vrot.lane.b32.xlu0 %v113_v11, %s143_s13  ;;  %73 = vrot.lane.b32.xlu1 %v114_v12, %s144_s14 }
  0x1a   :  { %79 = vrot.lane.b32.xlu0 %v115_v13, %s145_s19  ;;  %85 = vrot.lane.b32.xlu1 %v116_v14, %s146_s20 }
  0x1e   :  { %91 = vrot.lane.b32.xlu0 %v117_v15, %s147_s0 }
  0x74   :  { %v8_v16 = vpop.permute.xlu0 %7   ;;  %v20_v17 = vpop.permute.xlu1 %19  }
  0x75   :  { %10 = vst.msk [vmem:[#allocation0] sm:$0x1] %vm9_vm1, %v8_v16  }
  0x78   :  { %v14_v18 = vpop.permute.xlu0 %13   ;;  %v26_v19 = vpop.permute.xlu1 %25  }
  0x79   :  { %16 = vst.msk [vmem:[#allocation0] sm:$0x1] %vm15_vm2, %v14_v18  }
  0x7a   :  { %22 = vst.msk [vmem:[#allocation0] sm:$0x1] %vm21_vm3, %v20_v17  }
  0x7b   :  { %28 = vst.msk [vmem:[#allocation0] sm:$0x1] %vm27_vm4, %v26_v19  }
  0x7c   :  { %v32_v20 = vpop.permute.xlu0 %31   ;;  %v38_v21 = vpop.permute.xlu1 %37  }
  0x7d   :  { %34 = vst.msk [vmem:[#allocation0] sm:$0x1] %vm33_vm5, %v32_v20  }
  0x7e   :  { %40 = vst.msk [vmem:[#allocation0] sm:$0x1] %vm39_vm6, %v38_v21  }
  0x80   :  { %v44_v22 = vpop.permute.xlu0 %43   ;;  %v50_v23 = vpop.permute.xlu1 %49  }
  0x81   :  { %46 = vst.msk [vmem:[#allocation0] sm:$0x1] %vm45_vm7, %v44_v22  }
  0x82   :  { %52 = vst.msk [vmem:[#allocation0] sm:$0x1] %vm51_vm8, %v50_v23  }
  0x84   :  { %v56_v24 = vpop.permute.xlu0 %55   ;;  %v62_v25 = vpop.permute.xlu1 %61  }
  0x85   :  { %58 = vst.msk [vmem:[#allocation0] sm:$0x1] %vm57_vm9, %v56_v24  }
  0x86   :  { %64 = vst.msk [vmem:[#allocation0] sm:$0x1] %vm63_vm10, %v62_v25  }
  0x88   :  { %v68_v26 = vpop.permute.xlu0 %67   ;;  %v74_v27 = vpop.permute.xlu1 %73  }
  0x89   :  { %70 = vst.msk [vmem:[#allocation0] sm:$0x1] %vm69_vm11, %v68_v26  }
  0x8a   :  { %76 = vst.msk [vmem:[#allocation0] sm:$0x1] %vm75_vm12, %v74_v27  }
  0x8c   :  { %v80_v28 = vpop.permute.xlu0 %79   ;;  %v86_v29 = vpop.permute.xlu1 %85  }
  0x8d   :  { %82 = vst.msk [vmem:[#allocation0] sm:$0x1] %vm81_vm13, %v80_v28  }
  0x8e   :  { %88 = vst.msk [vmem:[#allocation0] sm:$0x1] %vm87_vm14, %v86_v29  }
  0x90   :  { %v92_v30 = vpop.permute.xlu0 %91  }
  0x91   :  { %94 = vst.msk [vmem:[#allocation0] sm:$0x1] %vm93_vm15, %v92_v30  }
  0x98   :  { %v99_v31 = vld [vmem:[#allocation0] sm:$0x1] }
  0x99   :  { %102 = vst [vmem:[%s210_s1] sm:$0x1] %v99_v31 }

// kernel: projector_forward.1
= control target key start
LH: loop header
LB: loop body
LE: loop exit
PB: predicated region body
PF: predicated region fallthrough
CT: control target
= control target key end

     0   :  { %v133_v0 = vmov 0.0   ;;  %vm134_vm0 = vmmov 0   ;;  %vm55_vm1 = vcmask 523264   ;;  %s176_s1 = inlined_call_operand.vmem [shape: bf16[64,128], index: 1, kind: input, shape index: {}]   ;;  %s177_s0 = inlined_call_operand.vmem [shape: bf16[8,64], index: 0, kind: input, shape index: {}]   ;;  %s178_s2 = inlined_call_operand.vmem [shape: f32[1,128], index: 2, kind: input, shape index: {}]   ;;  %s179_s3 = inlined_call_operand.vmem [shape: f32[8,128], index: 3, kind: output, shape index: {}]  }
   0x1   :  { %115 = vmatprep.subr.bf16.mxu0 %v133_v0  ;;  %v129_v1 = vld [vmem:[%s176_s1 + $0x18] sm:$0xff]   ;;  %123 = vmatprep.mubr.msk.bf16.mxu0 %vm134_vm0, %v133_v0  ;;  %v130_v2 = vld [vmem:[%s176_s1 + $0x10] sm:$0xff]   ;;  %v131_v3 = vld [vmem:[%s176_s1 + $0x8] sm:$0xff]  }
   0x2   :  { %116 = vmatpush3.bf16.msra.mxu0 %v129_v1  ;;  %v132_v4 = vld [vmem:[%s176_s1] sm:$0xff]  }
   0x3   :  { %117 = vmatprep.subr.bf16.mxu0 %v133_v0  ;;  %v15_v5 = vld [vmem:[%s177_s0] sm:$0xf] }
   0x4   :  { %v104_v6 = vld [vmem:[%s178_s2] ss:$0 sm:$0xff] }
   0x6   :  { %118 = vmatpush3.bf16.msra.mxu0 %v130_v2 }
   0x7   :  { %119 = vmatprep.subr.bf16.mxu0 %v133_v0 }
   0xa   :  { %120 = vmatpush3.bf16.msra.mxu0 %v131_v3 }
   0xb   :  { %121 = vmatprep.subr.bf16.mxu0 %v133_v0 }
   0xe   :  { %122 = vmatpush3.bf16.msra.mxu0 %v132_v4 }
  0x11   :  { %124 = vmatmul.mubr.msk.bf16.vlgmr.msra.gmra.mxu0 %vm55_vm1, %v15_v5 }
  0xd1   :  { %v93_v7 = vpop.f32.mrf.mxu0 }
  0xd2   :  { %v94_v8 = vadd.f32 %v104_v6, %v93_v7 }
  0xd3   :  { %v125_v9 = vpop.f32.mrf.mxu0 }
  0xd4   :  { %99 = vst [vmem:[%s179_s3] sm:$0xff] %v94_v8 }
  0xd5   :  { %v96_v10 = vpop.f32.mrf.mxu0 }
  0xd7   :  { %v126_v11 = vpop.f32.mrf.mxu0 }

</bundles_post_ra>
